<compile_context>
chip_gen: v6e
topology: v6e:2x2x1
jax: 0.10.0
libtpu: 0.0.40
codegen_flags: <defaults>
</compile_context>

<pallas_src>
import functools

import jax
import jax.numpy as jnp
from jax import lax
from jax.experimental import pallas as pl
from jax.experimental.pallas import tpu as pltpu


def _mlp_kernel(n_hidden_layers, *refs):
    # refs = (x_ref, w_in, b_in, [w_h_i, b_h_i]*n_hidden_layers, w_out, b_out, o_ref)
    x_ref = refs[0]
    o_ref = refs[-1]
    p = refs[1:-1]

    x = x_ref[...]  # (tile_n, in_dim): rows on sublanes, features on lanes.

    # fc_in + ReLU.  Contract W_in (hidden, in) dim 1 with x (tile_n, in) dim 1:
    # result is (hidden_dim, tile_n) — feature-major / lane-dense — without an
    # explicit transposed copy of x (same dot_general the einsum 'hk,nk->hn' emits).
    h = lax.dot_general(p[0][...], x, (((1,), (1,)), ((), ())),
                        preferred_element_type=jnp.float32)
    h = jnp.maximum(h + p[1][...], 0.0)

    # Hidden layers: Linear + ReLU, unrolled (n_hidden_layers is a trace-time const).
    for i in range(n_hidden_layers):
        w = p[2 + 2 * i][...]
        b = p[3 + 2 * i][...]
        h = jnp.dot(w, h, preferred_element_type=jnp.float32) + b
        h = jnp.maximum(h, 0.0)

    # fc_out (no activation) -> (out_dim, tile_n); unmasked lane-dense stores.
    y = jnp.dot(p[-2][...], h, preferred_element_type=jnp.float32) + p[-1][...]
    o_ref[...] = y.astype(o_ref.dtype)


def _pick_tile_n(n_rows, tile_n):
    """Effective row tile.

    Constraints / goals:
      * When tiled, the tile must be a multiple of 128 (lane-dense output blocks
        and an (8,*)-aligned input row dim).
      * Small inputs use one full-array block (block == array satisfies tiling,
        no padding needed).
      * >=256 rows: split into >=2 tiles so the 'parallel' axis can shard across
        both v7x TensorCores.
    """
    if n_rows > tile_n:
        return max(128, -(-tile_n // 128) * 128)
    if n_rows >= 256:
        half = -(-n_rows // 2)            # ceil(n_rows / 2)
        return -(-half // 128) * 128      # round up to a lane multiple
    return n_rows


def mlp_pallas(x, params, *, tile_n=4096, compute_dtype=None):
    """x: (..., in_dim).  params: PyTorch-layout weights.

    Weights: w has shape (fan_out, fan_in); bias has shape (fan_out, 1).
    Computes W @ x_col + b per layer (identical math to PyTorch x @ W.T + b).
    Optionally cast inputs/weights to `compute_dtype` (e.g. jnp.bfloat16) to halve
    HBM read traffic; accumulation stays f32 via preferred_element_type.
    """
    hidden_dim, in_dim = params["w_in"].shape
    out_dim = params["w_out"].shape[0]
    n_hidden_layers = len(params["w_hidden"])

    lead_shape = x.shape[:-1]
    out_dtype = x.dtype
    xf = x.reshape(-1, in_dim)          # view only: no transpose, no pad
    n_rows = xf.shape[0]

    flat_params = [params["w_in"], params["b_in"]]
    for w, b in zip(params["w_hidden"], params["b_hidden"]):
        flat_params += [w, b]
    flat_params += [params["w_out"], params["b_out"]]

    if compute_dtype is not None:
        xf = xf.astype(compute_dtype)
        flat_params = [pp.astype(compute_dtype) for pp in flat_params]

    tile_n_eff = _pick_tile_n(n_rows, tile_n)
    grid = (pl.cdiv(n_rows, tile_n_eff),)

    # Tiny params -> keep resident in VMEM as full-array blocks.
    param_specs = [pl.BlockSpec(pp.shape, lambda i: (0, 0)) for pp in flat_params]

    # Advisory cost estimate: firmly memory-bound.
    flops = 2 * n_rows * (in_dim * hidden_dim
                          + n_hidden_layers * hidden_dim * hidden_dim
                          + hidden_dim * out_dim)
    bytes_accessed = (xf.size * xf.dtype.itemsize
                      + n_rows * out_dim * jnp.dtype(out_dtype).itemsize
                      + sum(pp.size * pp.dtype.itemsize for pp in flat_params))

    outT = pl.pallas_call(
        functools.partial(_mlp_kernel, n_hidden_layers),
        out_shape=jax.ShapeDtypeStruct((out_dim, n_rows), out_dtype),
        grid_spec=pltpu.PrefetchScalarGridSpec(
            num_scalar_prefetch=0,
            grid=grid,
            in_specs=[pl.BlockSpec((tile_n_eff, in_dim), lambda i: (i, 0))]
                     + param_specs,
            out_specs=pl.BlockSpec((out_dim, tile_n_eff), lambda i: (0, i)),
        ),
        compiler_params=pltpu.CompilerParams(
            dimension_semantics=("parallel",),
        ),
        cost_estimate=pl.CostEstimate(
            flops=flops, transcendentals=0, bytes_accessed=bytes_accessed),
    )(xf, *flat_params)

    # Lane-dense kernel output -> row-major result.  Only out_dim*4 B/row; if the
    # consumer can use feature-major directly, fuse this .T into it instead.
    out = outT.T
    return out.reshape(*lead_shape, out_dim)


def init_mlp_params(key, in_dim, hidden_dim, out_dim, n_hidden_layers, dtype=jnp.float32):
    """Deterministic synthetic init (PyTorch-Linear-like uniform bounds).

    Weights stored in PyTorch layout (fan_out, fan_in); biases as (fan_out, 1).
    """
    def linear(k, fan_in, fan_out):
        kw, kb = jax.random.split(k)
        bound = 1.0 / jnp.sqrt(fan_in)
        w = jax.random.uniform(kw, (fan_out, fan_in), dtype, -bound, bound)
        b = jax.random.uniform(kb, (fan_out, 1), dtype, -bound, bound)
        return w, b

    keys = jax.random.split(key, 2 + n_hidden_layers)
    w_in, b_in = linear(keys[0], in_dim, hidden_dim)
    w_hidden, b_hidden = [], []
    for i in range(n_hidden_layers):
        w, b = linear(keys[1 + i], hidden_dim, hidden_dim)
        w_hidden.append(w)
        b_hidden.append(b)
    w_out, b_out = linear(keys[-1], hidden_dim, out_dim)
    return {
        "w_in": w_in, "b_in": b_in,
        "w_hidden": w_hidden, "b_hidden": b_hidden,
        "w_out": w_out, "b_out": b_out,
    }


def mlp_reference(x, params):
    """Pure-JAX reference matching the PyTorch forward semantics."""
    h = jnp.maximum(x @ params["w_in"].T + params["b_in"][:, 0], 0.0)
    for w, b in zip(params["w_hidden"], params["b_hidden"]):
        h = jnp.maximum(h @ w.T + b[:, 0], 0.0)
    return h @ params["w_out"].T + params["b_out"][:, 0]


if __name__ == "__main__":
    # config: {'in_dim': 16, 'hidden_dim': 32, 'out_dim': 8, 'n_hidden_layers': 2}
    in_dim, hidden_dim, out_dim, n_hidden_layers = 16, 32, 8, 2
    batch, seq = 2, 8

    key = jax.random.PRNGKey(0)
    kx, kp, kx2 = jax.random.split(key, 3)
    params = init_mlp_params(kp, in_dim, hidden_dim, out_dim, n_hidden_layers)

    # Small shape from the module config (single full-array block path).
    x = jax.random.normal(kx, (batch, seq, in_dim), dtype=jnp.float32)
    y = jax.block_until_ready(mlp_pallas(x, params))
    y_ref = mlp_reference(x, params)
    assert y.shape == (batch, seq, out_dim)
    assert jnp.allclose(y, y_ref, atol=1e-5, rtol=1e-5), "mismatch vs reference (small)"

    # Larger shape: exercises the multi-step 'parallel' grid and the partial
    # last block (1000 rows -> two 512-row tiles, second one partial).
    x2 = jax.random.normal(kx2, (5, 200, in_dim), dtype=jnp.float32)
    y2 = jax.block_until_ready(mlp_pallas(x2, params))
    y2_ref = mlp_reference(x2, params)
    assert y2.shape == (5, 200, out_dim)
    assert jnp.allclose(y2, y2_ref, atol=1e-4, rtol=1e-4), "mismatch vs reference (tiled)"

    print("KERNEL_OK")
</pallas_src>

<mosaic_0001>
module attributes {stable_mosaic.version = 11 : i64} {
  func.func @_mlp_kernel(%arg0: i32, %arg1: memref<16x16xf32, #tpu.memory_space<vmem>>, %arg2: memref<32x16xf32, #tpu.memory_space<vmem>>, %arg3: memref<32x1xf32, #tpu.memory_space<vmem>>, %arg4: memref<32x32xf32, #tpu.memory_space<vmem>>, %arg5: memref<32x1xf32, #tpu.memory_space<vmem>>, %arg6: memref<32x32xf32, #tpu.memory_space<vmem>>, %arg7: memref<32x1xf32, #tpu.memory_space<vmem>>, %arg8: memref<8x32xf32, #tpu.memory_space<vmem>>, %arg9: memref<8x1xf32, #tpu.memory_space<vmem>>, %arg10: memref<8x16xf32, #tpu.memory_space<vmem>>) attributes {dimension_semantics = [#tpu.dimension_semantics<parallel>], iteration_bounds = array<i64: 1>, scalar_prefetch = 0 : i64, scratch_operands = 0 : i64, tpu.core_type = #tpu.core_type<tc>, window_params = [{transform_indices = @transform_0, window_bounds = array<i64: 16, 16>}, {pipeline_mode = #tpu.pipeline_mode<synchronous>, transform_indices = @transform_1, window_bounds = array<i64: 32, 16>}, {pipeline_mode = #tpu.pipeline_mode<synchronous>, transform_indices = @transform_2, window_bounds = array<i64: 32, 1>}, {pipeline_mode = #tpu.pipeline_mode<synchronous>, transform_indices = @transform_3, window_bounds = array<i64: 32, 32>}, {pipeline_mode = #tpu.pipeline_mode<synchronous>, transform_indices = @transform_4, window_bounds = array<i64: 32, 1>}, {pipeline_mode = #tpu.pipeline_mode<synchronous>, transform_indices = @transform_5, window_bounds = array<i64: 32, 32>}, {pipeline_mode = #tpu.pipeline_mode<synchronous>, transform_indices = @transform_6, window_bounds = array<i64: 32, 1>}, {pipeline_mode = #tpu.pipeline_mode<synchronous>, transform_indices = @transform_7, window_bounds = array<i64: 8, 32>}, {pipeline_mode = #tpu.pipeline_mode<synchronous>, transform_indices = @transform_8, window_bounds = array<i64: 8, 1>}, {transform_indices = @transform_9, window_bounds = array<i64: 8, 16>}]} {
    %c0 = arith.constant 0 : index
    %c0_0 = arith.constant 0 : index
    %0 = vector.load %arg1[%c0, %c0_0] : memref<16x16xf32, #tpu.memory_space<vmem>>, vector<16x16xf32>
    %c0_1 = arith.constant 0 : index
    %c0_2 = arith.constant 0 : index
    %1 = vector.load %arg2[%c0_1, %c0_2] : memref<32x16xf32, #tpu.memory_space<vmem>>, vector<32x16xf32>
    %cst = arith.constant dense<0.000000e+00> : vector<32x16xf32>
    %2 = tpu.matmul %1, %0, %cst {dimension_numbers = #tpu.dot_dimension_numbers<[1], [1], [0], [0], [0, 0, 1, 0], [], []>} : vector<32x16xf32>, vector<16x16xf32>, vector<32x16xf32> -> vector<32x16xf32>
    %c0_3 = arith.constant 0 : index
    %c0_4 = arith.constant 0 : index
    %3 = vector.load %arg3[%c0_3, %c0_4] : memref<32x1xf32, #tpu.memory_space<vmem>>, vector<32x1xf32>
    %4 = vector.broadcast %3 : vector<32x1xf32> to vector<32x16xf32>
    %5 = arith.addf %2, %4 : vector<32x16xf32>
    %cst_5 = arith.constant 0.000000e+00 : f32
    %6 = vector.broadcast %cst_5 : f32 to vector<32x16xf32>
    %7 = arith.maximumf %5, %6 : vector<32x16xf32>
    %c0_6 = arith.constant 0 : index
    %c0_7 = arith.constant 0 : index
    %8 = vector.load %arg4[%c0_6, %c0_7] : memref<32x32xf32, #tpu.memory_space<vmem>>, vector<32x32xf32>
    %c0_8 = arith.constant 0 : index
    %c0_9 = arith.constant 0 : index
    %9 = vector.load %arg5[%c0_8, %c0_9] : memref<32x1xf32, #tpu.memory_space<vmem>>, vector<32x1xf32>
    %cst_10 = arith.constant dense<0.000000e+00> : vector<32x16xf32>
    %10 = tpu.matmul %8, %7, %cst_10 {dimension_numbers = #tpu.dot_dimension_numbers<[1], [0], [0], [1], [0, 0, 1, 1], [], []>} : vector<32x32xf32>, vector<32x16xf32>, vector<32x16xf32> -> vector<32x16xf32>
    %11 = vector.broadcast %9 : vector<32x1xf32> to vector<32x16xf32>
    %12 = arith.addf %10, %11 : vector<32x16xf32>
    %cst_11 = arith.constant 0.000000e+00 : f32
    %13 = vector.broadcast %cst_11 : f32 to vector<32x16xf32>
    %14 = arith.maximumf %12, %13 : vector<32x16xf32>
    %c0_12 = arith.constant 0 : index
    %c0_13 = arith.constant 0 : index
    %15 = vector.load %arg6[%c0_12, %c0_13] : memref<32x32xf32, #tpu.memory_space<vmem>>, vector<32x32xf32>
    %c0_14 = arith.constant 0 : index
    %c0_15 = arith.constant 0 : index
    %16 = vector.load %arg7[%c0_14, %c0_15] : memref<32x1xf32, #tpu.memory_space<vmem>>, vector<32x1xf32>
    %cst_16 = arith.constant dense<0.000000e+00> : vector<32x16xf32>
    %17 = tpu.matmul %15, %14, %cst_16 {dimension_numbers = #tpu.dot_dimension_numbers<[1], [0], [0], [1], [0, 0, 1, 1], [], []>} : vector<32x32xf32>, vector<32x16xf32>, vector<32x16xf32> -> vector<32x16xf32>
    %18 = vector.broadcast %16 : vector<32x1xf32> to vector<32x16xf32>
    %19 = arith.addf %17, %18 : vector<32x16xf32>
    %cst_17 = arith.constant 0.000000e+00 : f32
    %20 = vector.broadcast %cst_17 : f32 to vector<32x16xf32>
    %21 = arith.maximumf %19, %20 : vector<32x16xf32>
    %c0_18 = arith.constant 0 : index
    %c0_19 = arith.constant 0 : index
    %22 = vector.load %arg8[%c0_18, %c0_19] : memref<8x32xf32, #tpu.memory_space<vmem>>, vector<8x32xf32>
    %cst_20 = arith.constant dense<0.000000e+00> : vector<8x16xf32>
    %23 = tpu.matmul %22, %21, %cst_20 {dimension_numbers = #tpu.dot_dimension_numbers<[1], [0], [0], [1], [0, 0, 1, 1], [], []>} : vector<8x32xf32>, vector<32x16xf32>, vector<8x16xf32> -> vector<8x16xf32>
    %c0_21 = arith.constant 0 : index
    %c0_22 = arith.constant 0 : index
    %24 = vector.load %arg9[%c0_21, %c0_22] : memref<8x1xf32, #tpu.memory_space<vmem>>, vector<8x1xf32>
    %25 = vector.broadcast %24 : vector<8x1xf32> to vector<8x16xf32>
    %26 = arith.addf %23, %25 : vector<8x16xf32>
    %c0_23 = arith.constant 0 : index
    %c0_24 = arith.constant 0 : index
    %27 = vector.load %arg10[%c0_23, %c0_24] : memref<8x16xf32, #tpu.memory_space<vmem>>, vector<8x16xf32>
    tpu.vector_store %arg10[%c0_23, %c0_24], %26 {strides = array<i32>} : memref<8x16xf32, #tpu.memory_space<vmem>>, vector<8x16xf32>,
    return
  }
  func.func @transform_0(%arg0: i32) -> (i32, i32) {
    %c0_i32 = arith.constant 0 : i32
    %c0_i32_0 = arith.constant 0 : i32
    return %arg0, %c0_i32 : i32, i32
  }
  func.func @transform_1(%arg0: i32) -> (i32, i32) {
    %c0_i32 = arith.constant 0 : i32
    %c0_i32_0 = arith.constant 0 : i32
    %c0_i32_1 = arith.constant 0 : i32
    return %c0_i32, %c0_i32_0 : i32, i32
  }
  func.func @transform_2(%arg0: i32) -> (i32, i32) {
    %c0_i32 = arith.constant 0 : i32
    %c0_i32_0 = arith.constant 0 : i32
    %c0_i32_1 = arith.constant 0 : i32
    return %c0_i32, %c0_i32_0 : i32, i32
  }
  func.func @transform_3(%arg0: i32) -> (i32, i32) {
    %c0_i32 = arith.constant 0 : i32
    %c0_i32_0 = arith.constant 0 : i32
    %c0_i32_1 = arith.constant 0 : i32
    return %c0_i32, %c0_i32_0 : i32, i32
  }
  func.func @transform_4(%arg0: i32) -> (i32, i32) {
    %c0_i32 = arith.constant 0 : i32
    %c0_i32_0 = arith.constant 0 : i32
    %c0_i32_1 = arith.constant 0 : i32
    return %c0_i32, %c0_i32_0 : i32, i32
  }
  func.func @transform_5(%arg0: i32) -> (i32, i32) {
    %c0_i32 = arith.constant 0 : i32
    %c0_i32_0 = arith.constant 0 : i32
    %c0_i32_1 = arith.constant 0 : i32
    return %c0_i32, %c0_i32_0 : i32, i32
  }
  func.func @transform_6(%arg0: i32) -> (i32, i32) {
    %c0_i32 = arith.constant 0 : i32
    %c0_i32_0 = arith.constant 0 : i32
    %c0_i32_1 = arith.constant 0 : i32
    return %c0_i32, %c0_i32_0 : i32, i32
  }
  func.func @transform_7(%arg0: i32) -> (i32, i32) {
    %c0_i32 = arith.constant 0 : i32
    %c0_i32_0 = arith.constant 0 : i32
    %c0_i32_1 = arith.constant 0 : i32
    return %c0_i32, %c0_i32_0 : i32, i32
  }
  func.func @transform_8(%arg0: i32) -> (i32, i32) {
    %c0_i32 = arith.constant 0 : i32
    %c0_i32_0 = arith.constant 0 : i32
    %c0_i32_1 = arith.constant 0 : i32
    return %c0_i32, %c0_i32_0 : i32, i32
  }
  func.func @transform_9(%arg0: i32) -> (i32, i32) {
    %c0_i32 = arith.constant 0 : i32
    %c0_i32_0 = arith.constant 0 : i32
    return %c0_i32, %arg0 : i32, i32
  }
}

</mosaic_0001>

<bundles_post_ra>
// kernel: tpu_custom_call.1
= control target key start
LH: loop header
LB: loop body
LE: loop exit
PB: predicated region body
PF: predicated region fallthrough
CT: control target
= control target key end

     0   :  { %vm63_vm0 = vcmask 130048   ;;  %v644_v3 = vmov 0   ;;  %s803_s0 = inlined_call_operand.vmem [shape: f32[16,16], index: 0, kind: input, shape index: {}]   ;;  %s804_s1 = inlined_call_operand.vmem [shape: f32[32,16], index: 1, kind: input, shape index: {}]   ;;  %s805_s2 = inlined_call_operand.vmem [shape: f32[32,1], index: 2, kind: input, shape index: {}]   ;;  %s806_s3 = inlined_call_operand.vmem [shape: f32[32,32], index: 3, kind: input, shape index: {}]   ;;  %s807_s4 = inlined_call_operand.vmem [shape: f32[32,1], index: 4, kind: input, shape index: {}]   ;;  %s808_s5 = inlined_call_operand.vmem [shape: f32[32,32], index: 5, kind: input, shape index: {}]   ;;  %s809_s6 = inlined_call_operand.vmem [shape: f32[32,1], index: 6, kind: input, shape index: {}]   ;;  %s810_s7 = inlined_call_operand.vmem [shape: f32[8,32], index: 7, kind: input, shape index: {}]   ;;  %s811_s8 = inlined_call_operand.vmem [shape: f32[8,1], index: 8, kind: input, shape index: {}]   ;;  %s812_s9 = inlined_call_operand.hbm [shape: f32[8,16], index: 9, kind: output, shape index: {}]  }
   0x1   :  { %v34_v0 = vld [vmem:[%s803_s0 + $0x8] sm:$0xff]  ;;  %v33_v1 = vld [vmem:[%s803_s0] sm:$0xff]  ;;  %620 = vset.pattern.permute.xlu0 %v644_v3  ;;  %v42_v4 = vld [vmem:[%s805_s2 + $0x18] sm:$0xff]  ;;  %621 = vset.pattern.permute.xlu1 %v644_v3 }
   0x2   :  { %v35_v2 = vld [vmem:[%s804_s1] sm:$0xff]  ;;  %567 = vmatprep.subr.msk.mxu0 %vm63_vm0, %v34_v0  ;;  %60 = vperm.xlu0 %620, %v42_v4   ;;  %v40_v5 = vld [vmem:[%s805_s2 + $0x8] sm:$0xff]  ;;  %v41_v6 = vld [vmem:[%s805_s2 + $0x10] sm:$0xff] }
   0x3   :  { %571 = vmatprep.mubr.msk.f32.mxu0 %vm63_vm0, %v35_v2  ;;  %568 = vmatpush3.xpose.msk.msra.mxu0 %vm63_vm0, %v34_v0  ;;  %v36_v7 = vld [vmem:[%s804_s1 + $0x8] sm:$0xff]  ;;  %v39_v8 = vld [vmem:[%s805_s2] sm:$0xff] }
   0x4   :  { %569 = vmatprep.subr.msk.mxu0 %vm63_vm0, %v33_v1  ;;  %50 = vperm.xlu1 %621, %v40_v5  }
   0x7   :  { %570 = vmatpush3.xpose.msk.msra.mxu0 %vm63_vm0, %v33_v1 }
   0x8   :  { %14 = vsyncpa [#allocation3], 0  ;;  %v37_v9 = vld [vmem:[%s804_s1 + $0x10] sm:$0xff]  ;;  %55 = vperm.xlu0 %620, %v41_v6   ;;  %v178_v10 = vld [vmem:[%s807_s4 + $0x18] sm:$0xff]  ;;  %45 = vperm.xlu1 %621, %v39_v8   ;;  %vm199_vm1 = vcmask 261120   ;;  %v645_v60 = vmov 0.0  }
   0x9   :  { %v38_v11 = vld [vmem:[%s804_s1 + $0x18] sm:$0xff]  ;;  %v177_v12 = vld [vmem:[%s807_s4 + $0x10] sm:$0xff]  ;;  %v176_v13 = vld [vmem:[%s807_s4 + $0x8] sm:$0xff]  ;;  %vm646_vm2 = vmmov 0   ;;  %s647_s13 = smov [#allocation2]  }
   0xa   :  { %572 = vmatmul.mubr.msk.f32.vlgmr.msra.gmra.mxu0 %vm63_vm0, %v36_v7  ;;  %v175_v14 = vld [vmem:[%s807_s4] sm:$0xff]  ;;  %v308_v15 = vld [vmem:[%s809_s6 + $0x18] sm:$0xff]  ;;  %v307_v16 = vld [vmem:[%s809_s6 + $0x10] sm:$0xff]  ;;  %s517_s14 = sshll.u32 %s647_s13, 4  ;;  %s518_s14 = int_to_ptr.vmem [resolvable:$true] %s517_s14 }
   0xb   :  { %574 = vmatprep.mubr.msk.f32.mxu0 %vm63_vm0, %v37_v9  ;;  %v306_v17 = vld [vmem:[%s809_s6 + $0x8] sm:$0xff]  ;;  %v305_v18 = vld [vmem:[%s809_s6] sm:$0xff]  ;;  %v173_v38 = vld [vmem:[%s806_s3 + $0x10] sm:$0xff]  ;;  %s622_s15 = scalar_lea.vmem %s518_s14, 128  ;;  %p627_p1 = scmp.lt.s32.totalorder %s518_s14, %s518_s14 }
   0xc   :  { %196 = vperm.xlu0 %620, %v178_v10   ;;  %191 = vperm.xlu1 %621, %v177_v12   ;;  %v431_v19 = vld [vmem:[%s811_s8] sm:$0xff]  ;;  %v172_v37 = vld [vmem:[%s806_s3 + $0x8] sm:$0xff]  ;;  %v174_v39 = vld [vmem:[%s806_s3 + $0x18] sm:$0xff]  ;;  %p623_p0 = scmp.ne.s32.totalorder %s518_s14, %s622_s15  ;;  %p628_p2 = scmp.lt.s32.totalorder %s622_s15, %s622_s15 }
   0xd   :  { %v171_v20 = vld [vmem:[%s806_s3] sm:$0xff]  ;;  %v302_v57 = vld [vmem:[%s808_s5 + $0x8] sm:$0xff]  ;;  %v303_v58 = vld [vmem:[%s808_s5 + $0x10] sm:$0xff] }
   0xe   :  { %575 = vmatmul.mubr.msk.f32.gmra.mxu0 %vm63_vm0, %v38_v11  ;;  %585 = vmatprep.mubr.msk.f32.mxu1 %vm199_vm1, %v171_v20  ;;  %v301_v40 = vld [vmem:[%s808_s5] sm:$0xff]  ;;  %v304_v59 = vld [vmem:[%s808_s5 + $0x18] sm:$0xff]  ;;  %p629_p3 = por %p628_p2, %p627_p1 }
   0xf   :  { %599 = vmatprep.mubr.msk.f32.mxu0 %vm199_vm1, %v301_v40 }
  0x10   :  { %186 = vperm.xlu0 %620, %v176_v13   ;;  %181 = vperm.xlu1 %621, %v175_v14   ;;  %v430_v13 = vld [vmem:[%s810_s7] sm:$0xff]  ;;  %p630_p4 = pnand %p629_p3, %p623_p0 }
  0x14   :  { %326 = vperm.xlu0 %620, %v308_v15   ;;  %321 = vperm.xlu1 %621, %v307_v16  }
  0x18   :  { %316 = vperm.xlu0 %620, %v306_v17   ;;  %311 = vperm.xlu1 %621, %v305_v18  }
  0x1c   :  { %434 = vperm.xlu0 %620, %v431_v19  }
  0x7d   :  { %v61_v21 = vpop.permute.xlu0 %60 }
  0x7f   :  { %v51_v23 = vpop.permute.xlu1 %50 }
  0x83   :  { %v56_v27 = vpop.permute.xlu0 %55  ;;  %v46_v32 = vpop.permute.xlu1 %45 }
  0x87   :  { %v197_v41 = vpop.permute.xlu0 %196  ;;  %v192_v43 = vpop.permute.xlu1 %191 }
  0x8b   :  { %v187_v47 = vpop.permute.xlu0 %186  ;;  %v182_v52 = vpop.permute.xlu1 %181 }
  0x8f   :  { %v327_v61 = vpop.permute.xlu0 %326  ;;  %v322_v63 = vpop.permute.xlu1 %321 }
  0x93   :  { %v317_v3 = vpop.permute.xlu0 %316  ;;  %v312_v8 = vpop.permute.xlu1 %311 }
  0x97   :  { %v435_v14 = vpop.permute.xlu0 %434 }
  0xca   :  { %v573_v22 = vpop.f32.mrf.mxu0 }
  0xcb   :  { %v154_v29 = vadd.f32 %v573_v22, %v51_v23 }
  0xcc   :  { %v148_v24 = vpop.f32.mrf.mxu0 }
  0xcd   :  { %v149_v33 = vadd.f32 %v148_v24, %v46_v32  ;;  %v168_v35 = vmax.f32 %v154_v29, 0.0 }
  0xce   :  { %v576_v25 = vpop.f32.mrf.mxu0 }
  0xcf   :  { %v164_v26 = vadd.f32 %v576_v25, %v61_v21  ;;  %v167_v36 = vmax.f32 %v149_v33, 0.0 }
  0xd0   :  { %v158_v28 = vpop.f32.mrf.mxu0 }
  0xd1   :  { %v170_v30 = vmax.f32 %v164_v26, 0.0  ;;  %v159_v31 = vadd.f32 %v158_v28, %v56_v27 }
  0xd3   :  { %v169_v34 = vmax.f32 %v159_v31, 0.0  ;;  %577 = vmatprep.subr.mxu1 %v170_v30 }
  0xd4   :  { %578 = vmatpush3.msra.mxu1 %v170_v30 }
  0xd5   :  { %579 = vmatprep.subr.mxu1 %v169_v34 }
  0xd6   :  { %580 = vmatpush3.msra.mxu1 %v169_v34 }
  0xd7   :  { %581 = vmatprep.subr.mxu1 %v168_v35 }
  0xd8   :  { %582 = vmatpush3.msra.mxu1 %v168_v35 }
  0xd9   :  { %583 = vmatprep.subr.mxu1 %v167_v36 }
  0xda   :  { %584 = vmatpush3.msra.mxu1 %v167_v36 }
  0xdb   :  { %586 = vmatmul.mubr.msk.f32.vlgmr.msra.gmra.mxu1 %vm199_vm1, %v172_v37  ;;  %605 = vmatprep.subr.mxu1 %v645_v60 }
  0xdc   :  { %588 = vmatprep.mubr.msk.f32.mxu1 %vm199_vm1, %v173_v38 }
  0xdf   :  { %589 = vmatmul.mubr.msk.f32.gmra.mxu1 %vm199_vm1, %v174_v39 }
  0xe0   :  { %613 = vmatprep.mubr.msk.f32.mxu1 %vm646_vm2, %v645_v60 }
 0x19b   :  { %v587_v42 = vpop.f32.mrf.mxu1 }
 0x19c   :  { %v284_v49 = vadd.f32 %v587_v42, %v187_v47 }
 0x19d   :  { %v278_v44 = vpop.f32.mrf.mxu1 }
 0x19e   :  { %v279_v53 = vadd.f32 %v278_v44, %v182_v52  ;;  %v298_v55 = vmax.f32 %v284_v49, 0.0 }
 0x19f   :  { %v590_v45 = vpop.f32.mrf.mxu1 }
 0x1a0   :  { %v294_v46 = vadd.f32 %v590_v45, %v197_v41  ;;  %v297_v56 = vmax.f32 %v279_v53, 0.0 }
 0x1a1   :  { %v288_v48 = vpop.f32.mrf.mxu1 }
 0x1a2   :  { %v300_v50 = vmax.f32 %v294_v46, 0.0  ;;  %v289_v51 = vadd.f32 %v288_v48, %v192_v43 }
 0x1a4   :  { %v299_v54 = vmax.f32 %v289_v51, 0.0  ;;  %591 = vmatprep.subr.mxu0 %v300_v50 }
 0x1a5   :  { %592 = vmatpush3.msra.mxu0 %v300_v50 }
 0x1a6   :  { %593 = vmatprep.subr.mxu0 %v299_v54 }
 0x1a7   :  { %594 = vmatpush3.msra.mxu0 %v299_v54 }
 0x1a8   :  { %595 = vmatprep.subr.mxu0 %v298_v55 }
 0x1a9   :  { %596 = vmatpush3.msra.mxu0 %v298_v55 }
 0x1aa   :  { %597 = vmatprep.subr.mxu0 %v297_v56 }
 0x1ab   :  { %598 = vmatpush3.msra.mxu0 %v297_v56 }
 0x1ac   :  { %600 = vmatmul.mubr.msk.f32.vlgmr.msra.gmra.mxu0 %vm199_vm1, %v302_v57 }
 0x1ad   :  { %602 = vmatprep.mubr.msk.f32.mxu0 %vm199_vm1, %v303_v58 }
 0x1b0   :  { %603 = vmatmul.mubr.msk.f32.gmra.mxu0 %vm199_vm1, %v304_v59 }
 0x26c   :  { %v601_v62 = vpop.f32.mrf.mxu0 }
 0x26d   :  { %v413_v5 = vadd.f32 %v601_v62, %v317_v3 }
 0x26e   :  { %v407_v0 = vpop.f32.mrf.mxu0 }
 0x26f   :  { %v408_v9 = vadd.f32 %v407_v0, %v312_v8  ;;  %v427_v11 = vmax.f32 %v413_v5, 0.0 }
 0x270   :  { %v604_v1 = vpop.f32.mrf.mxu0 }
 0x271   :  { %v423_v2 = vadd.f32 %v604_v1, %v327_v61  ;;  %v426_v12 = vmax.f32 %v408_v9, 0.0 }
 0x272   :  { %v417_v4 = vpop.f32.mrf.mxu0 }
 0x273   :  { %v429_v6 = vmax.f32 %v423_v2, 0.0  ;;  %v418_v7 = vadd.f32 %v417_v4, %v322_v63 }
 0x275   :  { %v428_v10 = vmax.f32 %v418_v7, 0.0  ;;  %606 = vmatpush3.msra.mxu1 %v429_v6 }
 0x276   :  { %607 = vmatprep.subr.mxu1 %v645_v60 }
 0x277   :  { %608 = vmatpush3.msra.mxu1 %v428_v10 }
 0x278   :  { %609 = vmatprep.subr.mxu1 %v645_v60 }
 0x279   :  { %610 = vmatpush3.msra.mxu1 %v427_v11 }
 0x27a   :  { %611 = vmatprep.subr.mxu1 %v645_v60 }
 0x27b   :  { %612 = vmatpush3.msra.mxu1 %v426_v12 }
 0x27c   :  { %614 = vmatmul.mubr.msk.f32.vlgmr.msra.gmra.mxu1 %vm199_vm1, %v430_v13 }
 0x33c   :  { %v506_v15 = vpop.f32.mrf.mxu1 }
 0x33d   :  { %v507_v16 = vadd.f32 %v506_v15, %v435_v14 }
 0x33e   :  { %v615_v17 = vpop.f32.mrf.mxu1 }
 0x33f   :  { %510 = vst.msk [vmem:[#allocation2] sm:$0xff] %vm63_vm0, %v507_v16 }
 0x340   :  { %633 = shalt.err (!%p630_p4)
}
 0x341   :  { %520 = dma.vmem_to_hbm [thread:$0]  %s518_s14, 128, %s812_s9, [#allocation3]  }
 0x342   :  { %642 = dma.done.wait [#allocation3], 128  }
 0x343   :  { %643 = vsyncadd [#allocation3], 4294967168 }
 0x344   :  { %524 = vsyncpa [#allocation3], 1 }

</bundles_post_ra>
